<compile_context>
chip_gen: v5e
topology: v5e:2x2
jax: 0.10.0
libtpu: 0.0.40
codegen_flags: <defaults>
</compile_context>

<pallas_src>
import functools

import jax
import jax.numpy as jnp
from jax.experimental import pallas as pl
from jax.experimental.pallas import tpu as pltpu

BN_EPS = 1e-5
K_CONV = 3                                # every conv is Conv1d(kernel=3, padding=1)
_VMEM_LIMIT_BYTES = 48 * 1024 * 1024      # <= physical VMEM on v5e/v6e (128M) and v7x (64M)


def _round_up(x, m):
    return ((x + m - 1) // m) * m


def _pick_cout_tile(cout, cap=128):
    """Largest multiple-of-8 divisor of cout that is <= cap, else cout (full block)."""
    if cout <= cap:
        return cout
    for t in range(cap, 7, -8):
        if cout % t == 0:
            return t
    return cout


# ----------------------------------------------------------------------------
# Fused Conv1d(3, pad=1) + BatchNorm1d(eval) + ReLU + MaxPool1d(P, P)
# ----------------------------------------------------------------------------
def _conv_block_kernel(xs_ref, w_ref, t_ref, o_ref, acc_ref, *, P):
    """One (Cout-tile, column-tile) of a fused conv block.

    xs_ref:  (P, K*Cin, TN) tap-stacked, phase-split, batch-packed input (bf16).
    w_ref:   (TC, K*Cin)    conv weights with BN scale folded in (bf16).
    t_ref:   (TC, 1)        folded shift = bias*scale + beta - mean*scale (f32).
    o_ref:   (TC, TN)       pooled output tile (lane-dense).
    acc_ref: (TC, TN)       f32 VMEM accumulator scratch.
    """
    acc_ref[...] = jnp.dot(w_ref[...], xs_ref[0],
                           preferred_element_type=jnp.float32)
    for p in range(1, P):      # MaxPool1d(P, P) == element-wise max over phases (VPU)
        acc_ref[...] = jnp.maximum(
            acc_ref[...],
            jnp.dot(w_ref[...], xs_ref[p], preferred_element_type=jnp.float32))
    # The shift is phase-constant and ReLU is monotone, so both commute with the max,
    # matching conv -> bn -> relu -> pool.
    o_ref[...] = jnp.maximum(acc_ref[...] + t_ref[...], 0.0).astype(o_ref.dtype)


def _stack_phases(x_cbl, P, K, Lo, cdtype):
    """Build the tap-stacked, phase-split, batch-packed conv input.

    x_cbl: (Cin, B, L).  Returns xs: (P, K*Cin, B*Lo) with
      xs[p, k*Cin + c, b*Lo + j] = xpad[c, b, j*P + p + k]
    where xpad is the per-sample zero-padded ('same' pad) input.  Each packed
    column maps to exactly one (sample, pooled-position), so there is no
    cross-sample mixing and odd lengths floor exactly like PyTorch MaxPool1d.
    """
    Cin, B, L = x_cbl.shape
    xp = jnp.pad(x_cbl, ((0, 0), (0, 0), (1, 1)))                 # (Cin, B, L+2)
    phases = []
    for p in range(P):
        taps = []
        for k in range(K):
            s = p + k
            taps.append(xp[:, :, s:s + (Lo - 1) * P + 1:P])       # (Cin, B, Lo)
        phases.append(jnp.concatenate(taps, axis=0).reshape(K * Cin, B * Lo))
    return jnp.stack(phases, axis=0).astype(cdtype)               # (P, K*Cin, B*Lo)


def conv_bn_relu_pool(x_cbl, wf, shift, pool, cdtype):
    """x_cbl: (Cin, B, L).  wf: (Cout, K*Cin) folded weights.  shift: (Cout, 1) f32.
    Returns (Cout, B, L // pool)."""
    Cin, B, L = x_cbl.shape
    Cout, KC = wf.shape
    K = KC // Cin
    assert K * Cin == KC and K == K_CONV, (Cin, KC)
    P = int(pool)
    Lo = L // P                      # PyTorch MaxPool1d floors odd lengths
    NJ = B * Lo                      # packed output columns (one per (b, j))

    xs = _stack_phases(x_cbl, P, K, Lo, cdtype)                   # (P, KC, NJ)

    # Lane-dense packed-column axis: pad to a multiple of 128 and tile it.
    NJp = _round_up(NJ, 128)
    TN = next(c for c in (512, 384, 256, 128) if NJp % c == 0)
    if NJp > NJ:
        xs = jnp.pad(xs, ((0, 0), (0, 0), (0, NJp - NJ)))
    TC = _pick_cout_tile(Cout, 128)

    itm = jnp.dtype(cdtype).itemsize
    cost = pl.CostEstimate(
        flops=2 * Cout * KC * NJp * P,
        transcendentals=0,
        bytes_accessed=(P * KC * NJp + Cout * KC + Cout * NJp) * itm + Cout * 4)

    yflat = pl.pallas_call(
        functools.partial(_conv_block_kernel, P=P),
        out_shape=jax.ShapeDtypeStruct((Cout, NJp), cdtype),
        grid=(NJp // TN, Cout // TC),
        in_specs=[
            pl.BlockSpec((P, KC, TN), lambda j, i: (0, 0, j)),
            pl.BlockSpec((TC, KC), lambda j, i: (i, 0)),
            pl.BlockSpec((TC, 1), lambda j, i: (i, 0)),
        ],
        out_specs=pl.BlockSpec((TC, TN), lambda j, i: (i, j)),
        scratch_shapes=[pltpu.VMEM((TC, TN), jnp.float32)],
        compiler_params=pltpu.CompilerParams(
            dimension_semantics=("parallel", "parallel"),
            vmem_limit_bytes=_VMEM_LIMIT_BYTES),
        cost_estimate=cost,
    )(xs, wf, shift)

    # Drop the lane-padding columns; back to the (Cout, B, Lo) layout.
    return yflat[:, :NJ].reshape(Cout, B, Lo)


# ----------------------------------------------------------------------------
# AdaptiveAvgPool1d(7) — per-sample (C*B, L) @ (L, 7) matmul, exact PyTorch bins.
# ----------------------------------------------------------------------------
def _avgpool_kernel(x_ref, p_ref, o_ref):
    o_ref[...] = jnp.dot(x_ref[...], p_ref[...],
                         preferred_element_type=jnp.float32).astype(o_ref.dtype)


def adaptive_avg_pool1d(x_cbl, out_len):
    """x_cbl: (C, B, L). Returns (C*B, out_len) f32 (rows ordered c*B + b)."""
    C, B, L = x_cbl.shape
    rows = C * B
    xf = x_cbl.reshape(rows, L).astype(jnp.float32)
    bins = jnp.arange(out_len)
    starts = (bins * L) // out_len
    ends = ((bins + 1) * L + out_len - 1) // out_len              # ceil
    pos = jnp.arange(L)[:, None]
    pmat = ((pos >= starts[None, :]) & (pos < ends[None, :])).astype(jnp.float32)
    pmat = pmat / (ends - starts).astype(jnp.float32)[None, :]    # (L, out_len)
    cost = pl.CostEstimate(
        flops=2 * rows * L * out_len, transcendentals=0,
        bytes_accessed=(rows * L + L * out_len + rows * out_len) * 4)
    # Tiny op relative to the convs: one full-block call is sufficient.
    return pl.pallas_call(
        _avgpool_kernel,
        out_shape=jax.ShapeDtypeStruct((rows, out_len), jnp.float32),
        grid=(1,),
        in_specs=[pl.BlockSpec((rows, L), lambda i: (0, 0)),
                  pl.BlockSpec((L, out_len), lambda i: (0, 0))],
        out_specs=pl.BlockSpec((rows, out_len), lambda i: (0, 0)),
        compiler_params=pltpu.CompilerParams(dimension_semantics=("arbitrary",)),
        cost_estimate=cost,
    )(xf, pmat)


# ----------------------------------------------------------------------------
# Parameter prep (BN/bias fold — done once, not per forward call) & forward
# ----------------------------------------------------------------------------
def prepare_layers(layers, cdtype=jnp.bfloat16):
    prepped = []
    for layer in layers:
        w, b = layer["w"], layer["b"]
        Cout, Cin, K = w.shape
        scale = layer["gamma"] / jnp.sqrt(layer["var"] + BN_EPS)
        shift = (b * scale + layer["beta"] - layer["mean"] * scale)
        wf = (w * scale[:, None, None]).transpose(0, 2, 1).reshape(Cout, K * Cin)
        prepped.append(dict(
            wf=wf.astype(cdtype),
            shift=shift.astype(jnp.float32).reshape(Cout, 1),
            pool=int(layer["pool"])))
    return prepped


def vgg_forward(x, prepped_layers, out_len=7, compute_dtype=jnp.bfloat16):
    """x: (B, Cin, L) NCW like PyTorch. Returns (B, C_last * out_len)."""
    B = x.shape[0]
    xc = jnp.transpose(x, (1, 0, 2)).astype(compute_dtype)        # (C, B, L) layout
    for layer in prepped_layers:
        xc = conv_bn_relu_pool(xc, layer["wf"], layer["shift"], layer["pool"],
                               compute_dtype)
    C = xc.shape[0]
    y = adaptive_avg_pool1d(xc, out_len)                          # (C*B, out_len) f32
    return y.reshape(C, B, out_len).transpose(1, 0, 2).reshape(B, C * out_len)


def init_params(key, in_ch, cfg):
    """cfg: list of (out_channels, followed_by_maxpool).  Kaiming-normal (fan_out,
    relu) conv weights, zero bias; BN gamma=1, beta=0, running mean=0, var=1 —
    matching VGG._initialize_weights()."""
    layers = []
    c = in_ch
    for out_ch, pooled in cfg:
        key, k1 = jax.random.split(key)
        fan_out = out_ch * K_CONV
        w = jax.random.normal(k1, (out_ch, c, K_CONV), jnp.float32) * jnp.sqrt(
            2.0 / fan_out)
        layers.append(dict(
            w=w,
            b=jnp.zeros((out_ch,), jnp.float32),
            gamma=jnp.ones((out_ch,), jnp.float32),
            beta=jnp.zeros((out_ch,), jnp.float32),
            mean=jnp.zeros((out_ch,), jnp.float32),
            var=jnp.ones((out_ch,), jnp.float32),
            pool=2 if pooled else 1,
        ))
        c = out_ch
    return layers


# Plain-JAX reference (same bf16 operand cast, f32 math) for verification.
def reference_forward(x, layers, out_len=7, cdtype=jnp.bfloat16):
    x = x.astype(cdtype)
    for layer in layers:
        scale = layer["gamma"] / jnp.sqrt(layer["var"] + BN_EPS)
        shift = layer["b"] * scale + layer["beta"] - layer["mean"] * scale
        wf = (layer["w"] * scale[:, None, None]).astype(cdtype).astype(jnp.float32)
        xf = x.astype(jnp.float32)
        B, C, L = xf.shape
        xp = jnp.pad(xf, ((0, 0), (0, 0), (1, 1)))
        cols = jnp.stack([xp[:, :, k:k + L] for k in range(K_CONV)], axis=-1)
        y = jnp.einsum("bclk,ock->bol", cols, wf,
                       precision=jax.lax.Precision.HIGHEST)
        y = y + shift[None, :, None]
        y = jnp.maximum(y, 0.0)
        p = layer["pool"]
        if p > 1:
            y = y.reshape(B, y.shape[1], L // p, p).max(axis=-1)
        x = y.astype(cdtype)
    xf = x.astype(jnp.float32)
    B, C, L = xf.shape
    xf = xf.reshape(B, C, out_len, L // out_len).mean(axis=-1)
    return xf.reshape(B, -1)


def _run_case(key, B, Cin, L, cfg, randomize_bn=False, compute_dtype=jnp.bfloat16):
    kx, kp, kb = jax.random.split(key, 3)
    x = jax.random.normal(kx, (B, Cin, L), jnp.float32)
    layers = init_params(kp, Cin, cfg)
    if randomize_bn:   # exercise the BN/bias fold with non-trivial statistics
        for i, lyr in enumerate(layers):
            k1, k2, k3, k4, k5 = jax.random.split(jax.random.fold_in(kb, i), 5)
            n = lyr["w"].shape[0]
            lyr["b"] = 0.1 * jax.random.normal(k1, (n,), jnp.float32)
            lyr["gamma"] = 1.0 + 0.1 * jax.random.normal(k2, (n,), jnp.float32)
            lyr["beta"] = 0.1 * jax.random.normal(k3, (n,), jnp.float32)
            lyr["mean"] = 0.1 * jax.random.normal(k4, (n,), jnp.float32)
            lyr["var"] = jax.random.uniform(k5, (n,), jnp.float32, 0.5, 1.5)
    prepped = prepare_layers(layers, compute_dtype)
    fwd = jax.jit(lambda xx: vgg_forward(xx, prepped, compute_dtype=compute_dtype))
    out = jax.block_until_ready(fwd(x))
    ref = reference_forward(x, layers, cdtype=compute_dtype)
    assert out.shape == ref.shape, (out.shape, ref.shape)
    err = float(jnp.abs(out - ref).max())
    assert jnp.allclose(out, ref, atol=1e-2, rtol=1e-2), err
    return out


if __name__ == "__main__":
    key = jax.random.PRNGKey(0)
    k1, k2 = jax.random.split(key)

    # Small synthetic shapes consistent with the module's 1-D VGG forward:
    # scaled-down Conv-BN-ReLU(-MaxPool) feature stack, then AdaptiveAvgPool1d(7).
    out = _run_case(k1, B=2, Cin=4, L=56, cfg=[(8, True), (16, False), (16, True)])
    assert out.shape == (2, 16 * 7), out.shape

    # Regression check for cross-sample packing with B>2, two MaxPool(2) layers
    # and non-identity BatchNorm statistics.
    _run_case(k2, B=3, Cin=3, L=28, cfg=[(8, True), (8, True)], randomize_bn=True)

    print("KERNEL_OK")
</pallas_src>

<mosaic_0001>
module attributes {stable_mosaic.version = 11 : i64} {
  func.func @_conv_block_kernel(%arg0: i32, %arg1: i32, %arg2: memref<2x12x128xbf16, #tpu.memory_space<vmem>>, %arg3: memref<8x12xbf16, #tpu.memory_space<vmem>>, %arg4: memref<8x1xf32, #tpu.memory_space<vmem>>, %arg5: memref<8x128xbf16, #tpu.memory_space<vmem>>, %arg6: memref<8x128xf32, #tpu.memory_space<vmem>>) attributes {dimension_semantics = [#tpu.dimension_semantics<parallel>, #tpu.dimension_semantics<parallel>], iteration_bounds = array<i64: 1, 1>, scalar_prefetch = 0 : i64, scratch_operands = 1 : i64, tpu.core_type = #tpu.core_type<tc>, window_params = [{transform_indices = @transform_0, window_bounds = array<i64: 2, 12, 128>}, {transform_indices = @transform_1, window_bounds = array<i64: 8, 12>}, {transform_indices = @transform_2, window_bounds = array<i64: 8, 1>}, {transform_indices = @transform_3, window_bounds = array<i64: 8, 128>}]} {
    %c0 = arith.constant 0 : index
    %c0_0 = arith.constant 0 : index
    %0 = vector.load %arg3[%c0, %c0_0] : memref<8x12xbf16, #tpu.memory_space<vmem>>, vector<8x12xbf16>
    %c0_1 = arith.constant 0 : index
    %c0_2 = arith.constant 0 : index
    %c0_3 = arith.constant 0 : index
    %1 = vector.load %arg2[%c0_1, %c0_2, %c0_3] : memref<2x12x128xbf16, #tpu.memory_space<vmem>>, vector<1x12x128xbf16>
    %2 = vector.shape_cast %1 : vector<1x12x128xbf16> to vector<12x128xbf16>
    %cst = arith.constant dense<0.000000e+00> : vector<8x128xf32>
    %3 = tpu.matmul %0, %2, %cst {dimension_numbers = #tpu.dot_dimension_numbers<[1], [0], [0], [1], [0, 0, 1, 1], [], []>} : vector<8x12xbf16>, vector<12x128xbf16>, vector<8x128xf32> -> vector<8x128xf32>
    %c0_4 = arith.constant 0 : index
    %c0_5 = arith.constant 0 : index
    %4 = vector.load %arg6[%c0_4, %c0_5] : memref<8x128xf32, #tpu.memory_space<vmem>>, vector<8x128xf32>
    tpu.vector_store %arg6[%c0_4, %c0_5], %3 {strides = array<i32>} : memref<8x128xf32, #tpu.memory_space<vmem>>, vector<8x128xf32>,
    %c0_6 = arith.constant 0 : index
    %c0_7 = arith.constant 0 : index
    %5 = vector.load %arg6[%c0_6, %c0_7] : memref<8x128xf32, #tpu.memory_space<vmem>>, vector<8x128xf32>
    %c0_8 = arith.constant 0 : index
    %c0_9 = arith.constant 0 : index
    %6 = vector.load %arg3[%c0_8, %c0_9] : memref<8x12xbf16, #tpu.memory_space<vmem>>, vector<8x12xbf16>
    %c1 = arith.constant 1 : index
    %c0_10 = arith.constant 0 : index
    %c0_11 = arith.constant 0 : index
    %7 = vector.load %arg2[%c1, %c0_10, %c0_11] : memref<2x12x128xbf16, #tpu.memory_space<vmem>>, vector<1x12x128xbf16>
    %8 = vector.shape_cast %7 : vector<1x12x128xbf16> to vector<12x128xbf16>
    %cst_12 = arith.constant dense<0.000000e+00> : vector<8x128xf32>
    %9 = tpu.matmul %6, %8, %cst_12 {dimension_numbers = #tpu.dot_dimension_numbers<[1], [0], [0], [1], [0, 0, 1, 1], [], []>} : vector<8x12xbf16>, vector<12x128xbf16>, vector<8x128xf32> -> vector<8x128xf32>
    %10 = arith.maximumf %5, %9 : vector<8x128xf32>
    %c0_13 = arith.constant 0 : index
    %c0_14 = arith.constant 0 : index
    %11 = vector.load %arg6[%c0_13, %c0_14] : memref<8x128xf32, #tpu.memory_space<vmem>>, vector<8x128xf32>
    tpu.vector_store %arg6[%c0_13, %c0_14], %10 {strides = array<i32>} : memref<8x128xf32, #tpu.memory_space<vmem>>, vector<8x128xf32>,
    %c0_15 = arith.constant 0 : index
    %c0_16 = arith.constant 0 : index
    %12 = vector.load %arg6[%c0_15, %c0_16] : memref<8x128xf32, #tpu.memory_space<vmem>>, vector<8x128xf32>
    %c0_17 = arith.constant 0 : index
    %c0_18 = arith.constant 0 : index
    %13 = vector.load %arg4[%c0_17, %c0_18] : memref<8x1xf32, #tpu.memory_space<vmem>>, vector<8x1xf32>
    %14 = vector.broadcast %13 : vector<8x1xf32> to vector<8x128xf32>
    %15 = arith.addf %12, %14 : vector<8x128xf32>
    %cst_19 = arith.constant 0.000000e+00 : f32
    %16 = vector.broadcast %cst_19 : f32 to vector<8x128xf32>
    %17 = arith.maximumf %15, %16 : vector<8x128xf32>
    %18 = arith.truncf %17 : vector<8x128xf32> to vector<8x128xbf16>
    %c0_20 = arith.constant 0 : index
    %c0_21 = arith.constant 0 : index
    %19 = vector.load %arg5[%c0_20, %c0_21] : memref<8x128xbf16, #tpu.memory_space<vmem>>, vector<8x128xbf16>
    tpu.vector_store %arg5[%c0_20, %c0_21], %18 {strides = array<i32>} : memref<8x128xbf16, #tpu.memory_space<vmem>>, vector<8x128xbf16>,
    return
  }
  func.func @transform_0(%arg0: i32, %arg1: i32) -> (i32, i32, i32) {
    %c0_i32 = arith.constant 0 : i32
    %c0_i32_0 = arith.constant 0 : i32
    %c0_i32_1 = arith.constant 0 : i32
    return %c0_i32, %c0_i32_0, %arg0 : i32, i32, i32
  }
  func.func @transform_1(%arg0: i32, %arg1: i32) -> (i32, i32) {
    %c0_i32 = arith.constant 0 : i32
    %c0_i32_0 = arith.constant 0 : i32
    return %arg1, %c0_i32 : i32, i32
  }
  func.func @transform_2(%arg0: i32, %arg1: i32) -> (i32, i32) {
    %c0_i32 = arith.constant 0 : i32
    %c0_i32_0 = arith.constant 0 : i32
    return %arg1, %c0_i32 : i32, i32
  }
  func.func @transform_3(%arg0: i32, %arg1: i32) -> (i32, i32) {
    %c0_i32 = arith.constant 0 : i32
    return %arg1, %arg0 : i32, i32
  }
}

module attributes {stable_mosaic.version = 11 : i64} {
  func.func @_conv_block_kernel(%arg0: i32, %arg1: i32, %arg2: memref<1x24x128xbf16, #tpu.memory_space<vmem>>, %arg3: memref<16x24xbf16, #tpu.memory_space<vmem>>, %arg4: memref<16x1xf32, #tpu.memory_space<vmem>>, %arg5: memref<16x128xbf16, #tpu.memory_space<vmem>>, %arg6: memref<16x128xf32, #tpu.memory_space<vmem>>) attributes {dimension_semantics = [#tpu.dimension_semantics<parallel>, #tpu.dimension_semantics<parallel>], iteration_bounds = array<i64: 1, 1>, scalar_prefetch = 0 : i64, scratch_operands = 1 : i64, tpu.core_type = #tpu.core_type<tc>, window_params = [{transform_indices = @transform_0, window_bounds = array<i64: 1, 24, 128>}, {transform_indices = @transform_1, window_bounds = array<i64: 16, 24>}, {transform_indices = @transform_2, window_bounds = array<i64: 16, 1>}, {transform_indices = @transform_3, window_bounds = array<i64: 16, 128>}]} {
    %c0 = arith.constant 0 : index
    %c0_0 = arith.constant 0 : index
    %0 = vector.load %arg3[%c0, %c0_0] : memref<16x24xbf16, #tpu.memory_space<vmem>>, vector<16x24xbf16>
    %c0_1 = arith.constant 0 : index
    %c0_2 = arith.constant 0 : index
    %c0_3 = arith.constant 0 : index
    %1 = vector.load %arg2[%c0_1, %c0_2, %c0_3] : memref<1x24x128xbf16, #tpu.memory_space<vmem>>, vector<1x24x128xbf16>
    %2 = vector.shape_cast %1 : vector<1x24x128xbf16> to vector<24x128xbf16>
    %cst = arith.constant dense<0.000000e+00> : vector<16x128xf32>
    %3 = tpu.matmul %0, %2, %cst {dimension_numbers = #tpu.dot_dimension_numbers<[1], [0], [0], [1], [0, 0, 1, 1], [], []>} : vector<16x24xbf16>, vector<24x128xbf16>, vector<16x128xf32> -> vector<16x128xf32>
    %c0_4 = arith.constant 0 : index
    %c0_5 = arith.constant 0 : index
    %4 = vector.load %arg6[%c0_4, %c0_5] : memref<16x128xf32, #tpu.memory_space<vmem>>, vector<16x128xf32>
    tpu.vector_store %arg6[%c0_4, %c0_5], %3 {strides = array<i32>} : memref<16x128xf32, #tpu.memory_space<vmem>>, vector<16x128xf32>,
    %c0_6 = arith.constant 0 : index
    %c0_7 = arith.constant 0 : index
    %5 = vector.load %arg6[%c0_6, %c0_7] : memref<16x128xf32, #tpu.memory_space<vmem>>, vector<16x128xf32>
    %c0_8 = arith.constant 0 : index
    %c0_9 = arith.constant 0 : index
    %6 = vector.load %arg4[%c0_8, %c0_9] : memref<16x1xf32, #tpu.memory_space<vmem>>, vector<16x1xf32>
    %7 = vector.broadcast %6 : vector<16x1xf32> to vector<16x128xf32>
    %8 = arith.addf %5, %7 : vector<16x128xf32>
    %cst_10 = arith.constant 0.000000e+00 : f32
    %9 = vector.broadcast %cst_10 : f32 to vector<16x128xf32>
    %10 = arith.maximumf %8, %9 : vector<16x128xf32>
    %11 = arith.truncf %10 : vector<16x128xf32> to vector<16x128xbf16>
    %c0_11 = arith.constant 0 : index
    %c0_12 = arith.constant 0 : index
    %12 = vector.load %arg5[%c0_11, %c0_12] : memref<16x128xbf16, #tpu.memory_space<vmem>>, vector<16x128xbf16>
    tpu.vector_store %arg5[%c0_11, %c0_12], %11 {strides = array<i32>} : memref<16x128xbf16, #tpu.memory_space<vmem>>, vector<16x128xbf16>,
    return
  }
  func.func @transform_0(%arg0: i32, %arg1: i32) -> (i32, i32, i32) {
    %c0_i32 = arith.constant 0 : i32
    %c0_i32_0 = arith.constant 0 : i32
    %c0_i32_1 = arith.constant 0 : i32
    return %c0_i32, %c0_i32_0, %arg0 : i32, i32, i32
  }
  func.func @transform_1(%arg0: i32, %arg1: i32) -> (i32, i32) {
    %c0_i32 = arith.constant 0 : i32
    %c0_i32_0 = arith.constant 0 : i32
    return %arg1, %c0_i32 : i32, i32
  }
  func.func @transform_2(%arg0: i32, %arg1: i32) -> (i32, i32) {
    %c0_i32 = arith.constant 0 : i32
    %c0_i32_0 = arith.constant 0 : i32
    return %arg1, %c0_i32 : i32, i32
  }
  func.func @transform_3(%arg0: i32, %arg1: i32) -> (i32, i32) {
    %c0_i32 = arith.constant 0 : i32
    return %arg1, %arg0 : i32, i32
  }
}

module attributes {stable_mosaic.version = 11 : i64} {
  func.func @_conv_block_kernel(%arg0: i32, %arg1: i32, %arg2: memref<2x48x128xbf16, #tpu.memory_space<vmem>>, %arg3: memref<16x48xbf16, #tpu.memory_space<vmem>>, %arg4: memref<16x1xf32, #tpu.memory_space<vmem>>, %arg5: memref<16x128xbf16, #tpu.memory_space<vmem>>, %arg6: memref<16x128xf32, #tpu.memory_space<vmem>>) attributes {dimension_semantics = [#tpu.dimension_semantics<parallel>, #tpu.dimension_semantics<parallel>], iteration_bounds = array<i64: 1, 1>, scalar_prefetch = 0 : i64, scratch_operands = 1 : i64, tpu.core_type = #tpu.core_type<tc>, window_params = [{transform_indices = @transform_0, window_bounds = array<i64: 2, 48, 128>}, {transform_indices = @transform_1, window_bounds = array<i64: 16, 48>}, {transform_indices = @transform_2, window_bounds = array<i64: 16, 1>}, {transform_indices = @transform_3, window_bounds = array<i64: 16, 128>}]} {
    %c0 = arith.constant 0 : index
    %c0_0 = arith.constant 0 : index
    %0 = vector.load %arg3[%c0, %c0_0] : memref<16x48xbf16, #tpu.memory_space<vmem>>, vector<16x48xbf16>
    %c0_1 = arith.constant 0 : index
    %c0_2 = arith.constant 0 : index
    %c0_3 = arith.constant 0 : index
    %1 = vector.load %arg2[%c0_1, %c0_2, %c0_3] : memref<2x48x128xbf16, #tpu.memory_space<vmem>>, vector<1x48x128xbf16>
    %2 = vector.shape_cast %1 : vector<1x48x128xbf16> to vector<48x128xbf16>
    %cst = arith.constant dense<0.000000e+00> : vector<16x128xf32>
    %3 = tpu.matmul %0, %2, %cst {dimension_numbers = #tpu.dot_dimension_numbers<[1], [0], [0], [1], [0, 0, 1, 1], [], []>} : vector<16x48xbf16>, vector<48x128xbf16>, vector<16x128xf32> -> vector<16x128xf32>
    %c0_4 = arith.constant 0 : index
    %c0_5 = arith.constant 0 : index
    %4 = vector.load %arg6[%c0_4, %c0_5] : memref<16x128xf32, #tpu.memory_space<vmem>>, vector<16x128xf32>
    tpu.vector_store %arg6[%c0_4, %c0_5], %3 {strides = array<i32>} : memref<16x128xf32, #tpu.memory_space<vmem>>, vector<16x128xf32>,
    %c0_6 = arith.constant 0 : index
    %c0_7 = arith.constant 0 : index
    %5 = vector.load %arg6[%c0_6, %c0_7] : memref<16x128xf32, #tpu.memory_space<vmem>>, vector<16x128xf32>
    %c0_8 = arith.constant 0 : index
    %c0_9 = arith.constant 0 : index
    %6 = vector.load %arg3[%c0_8, %c0_9] : memref<16x48xbf16, #tpu.memory_space<vmem>>, vector<16x48xbf16>
    %c1 = arith.constant 1 : index
    %c0_10 = arith.constant 0 : index
    %c0_11 = arith.constant 0 : index
    %7 = vector.load %arg2[%c1, %c0_10, %c0_11] : memref<2x48x128xbf16, #tpu.memory_space<vmem>>, vector<1x48x128xbf16>
    %8 = vector.shape_cast %7 : vector<1x48x128xbf16> to vector<48x128xbf16>
    %cst_12 = arith.constant dense<0.000000e+00> : vector<16x128xf32>
    %9 = tpu.matmul %6, %8, %cst_12 {dimension_numbers = #tpu.dot_dimension_numbers<[1], [0], [0], [1], [0, 0, 1, 1], [], []>} : vector<16x48xbf16>, vector<48x128xbf16>, vector<16x128xf32> -> vector<16x128xf32>
    %10 = arith.maximumf %5, %9 : vector<16x128xf32>
    %c0_13 = arith.constant 0 : index
    %c0_14 = arith.constant 0 : index
    %11 = vector.load %arg6[%c0_13, %c0_14] : memref<16x128xf32, #tpu.memory_space<vmem>>, vector<16x128xf32>
    tpu.vector_store %arg6[%c0_13, %c0_14], %10 {strides = array<i32>} : memref<16x128xf32, #tpu.memory_space<vmem>>, vector<16x128xf32>,
    %c0_15 = arith.constant 0 : index
    %c0_16 = arith.constant 0 : index
    %12 = vector.load %arg6[%c0_15, %c0_16] : memref<16x128xf32, #tpu.memory_space<vmem>>, vector<16x128xf32>
    %c0_17 = arith.constant 0 : index
    %c0_18 = arith.constant 0 : index
    %13 = vector.load %arg4[%c0_17, %c0_18] : memref<16x1xf32, #tpu.memory_space<vmem>>, vector<16x1xf32>
    %14 = vector.broadcast %13 : vector<16x1xf32> to vector<16x128xf32>
    %15 = arith.addf %12, %14 : vector<16x128xf32>
    %cst_19 = arith.constant 0.000000e+00 : f32
    %16 = vector.broadcast %cst_19 : f32 to vector<16x128xf32>
    %17 = arith.maximumf %15, %16 : vector<16x128xf32>
    %18 = arith.truncf %17 : vector<16x128xf32> to vector<16x128xbf16>
    %c0_20 = arith.constant 0 : index
    %c0_21 = arith.constant 0 : index
    %19 = vector.load %arg5[%c0_20, %c0_21] : memref<16x128xbf16, #tpu.memory_space<vmem>>, vector<16x128xbf16>
    tpu.vector_store %arg5[%c0_20, %c0_21], %18 {strides = array<i32>} : memref<16x128xbf16, #tpu.memory_space<vmem>>, vector<16x128xbf16>,
    return
  }
  func.func @transform_0(%arg0: i32, %arg1: i32) -> (i32, i32, i32) {
    %c0_i32 = arith.constant 0 : i32
    %c0_i32_0 = arith.constant 0 : i32
    %c0_i32_1 = arith.constant 0 : i32
    return %c0_i32, %c0_i32_0, %arg0 : i32, i32, i32
  }
  func.func @transform_1(%arg0: i32, %arg1: i32) -> (i32, i32) {
    %c0_i32 = arith.constant 0 : i32
    %c0_i32_0 = arith.constant 0 : i32
    return %arg1, %c0_i32 : i32, i32
  }
  func.func @transform_2(%arg0: i32, %arg1: i32) -> (i32, i32) {
    %c0_i32 = arith.constant 0 : i32
    %c0_i32_0 = arith.constant 0 : i32
    return %arg1, %c0_i32 : i32, i32
  }
  func.func @transform_3(%arg0: i32, %arg1: i32) -> (i32, i32) {
    %c0_i32 = arith.constant 0 : i32
    return %arg1, %arg0 : i32, i32
  }
}

module attributes {stable_mosaic.version = 11 : i64} {
  func.func @_avgpool_kernel(%arg0: i32, %arg1: memref<32x14xf32, #tpu.memory_space<vmem>>, %arg2: memref<14x7xf32, #tpu.memory_space<vmem>>, %arg3: memref<32x7xf32, #tpu.memory_space<vmem>>) attributes {dimension_semantics = [#tpu.dimension_semantics<arbitrary>], iteration_bounds = array<i64: 1>, scalar_prefetch = 0 : i64, scratch_operands = 0 : i64, tpu.core_type = #tpu.core_type<tc>, window_params = [{pipeline_mode = #tpu.pipeline_mode<synchronous>, transform_indices = @transform_0, window_bounds = array<i64: 32, 14>}, {pipeline_mode = #tpu.pipeline_mode<synchronous>, transform_indices = @transform_1, window_bounds = array<i64: 14, 7>}, {pipeline_mode = #tpu.pipeline_mode<synchronous>, transform_indices = @transform_2, window_bounds = array<i64: 32, 7>}]} {
    %c0 = arith.constant 0 : index
    %c0_0 = arith.constant 0 : index
    %0 = vector.load %arg1[%c0, %c0_0] : memref<32x14xf32, #tpu.memory_space<vmem>>, vector<32x14xf32>
    %c0_1 = arith.constant 0 : index
    %c0_2 = arith.constant 0 : index
    %1 = vector.load %arg2[%c0_1, %c0_2] : memref<14x7xf32, #tpu.memory_space<vmem>>, vector<14x7xf32>
    %cst = arith.constant dense<0.000000e+00> : vector<32x7xf32>
    %2 = tpu.matmul %0, %1, %cst {dimension_numbers = #tpu.dot_dimension_numbers<[1], [0], [0], [1], [0, 0, 1, 1], [], []>} : vector<32x14xf32>, vector<14x7xf32>, vector<32x7xf32> -> vector<32x7xf32>
    %c0_3 = arith.constant 0 : index
    %c0_4 = arith.constant 0 : index
    %3 = vector.load %arg3[%c0_3, %c0_4] : memref<32x7xf32, #tpu.memory_space<vmem>>, vector<32x7xf32>
    tpu.vector_store %arg3[%c0_3, %c0_4], %2 {strides = array<i32>} : memref<32x7xf32, #tpu.memory_space<vmem>>, vector<32x7xf32>,
    return
  }
  func.func @transform_0(%arg0: i32) -> (i32, i32) {
    %c0_i32 = arith.constant 0 : i32
    %c0_i32_0 = arith.constant 0 : i32
    %c0_i32_1 = arith.constant 0 : i32
    return %c0_i32, %c0_i32_0 : i32, i32
  }
  func.func @transform_1(%arg0: i32) -> (i32, i32) {
    %c0_i32 = arith.constant 0 : i32
    %c0_i32_0 = arith.constant 0 : i32
    %c0_i32_1 = arith.constant 0 : i32
    return %c0_i32, %c0_i32_0 : i32, i32
  }
  func.func @transform_2(%arg0: i32) -> (i32, i32) {
    %c0_i32 = arith.constant 0 : i32
    %c0_i32_0 = arith.constant 0 : i32
    %c0_i32_1 = arith.constant 0 : i32
    return %c0_i32, %c0_i32_0 : i32, i32
  }
}

</mosaic_0001>

<bundles_post_ra>
// kernel: _lambda_.4
= control target key start
LH: loop header
LB: loop body
LE: loop exit
PB: predicated region body
PF: predicated region fallthrough
CT: control target
= control target key end

     0   :  { %vm27_vm0 = vcmask 1045504   ;;  %v107_v3 = vmov 0   ;;  %vm23_vm1 = vcmask 97280   ;;  %s152_s0 = inlined_call_operand.vmem [shape: bf16[2,12,128], index: 0, kind: input, shape index: {}]   ;;  %s153_s2 = inlined_call_operand.vmem [shape: f32[8,1], index: 2, kind: input, shape index: {}]   ;;  %s154_s1 = inlined_call_operand.vmem [shape: bf16[8,12], index: 1, kind: input, shape index: {}]   ;;  %s155_s3 = inlined_call_operand.vmem [shape: bf16[8,128], index: 3, kind: output, shape index: {}]  }
   0x1   :  { %v93_v0 = vld [vmem:[%s152_s0] sm:$0xf]  ;;  %v103_v1 = vld [vmem:[%s152_s0] sm:$0x30]  ;;  %v100_v2 = vld [vmem:[%s152_s0 + $0x8] sm:$0xf]  ;;  %106 = vset.pattern.permute.xlu0 %v107_v3 }
   0x2   :  { %v94_v4 = vor.u32 %v103_v1, %v93_v0  ;;  %v104_v5 = vld [vmem:[%s152_s0 + $0x8] sm:$0x30]  ;;  %v77_v7 = vld [vmem:[%s153_s2] sm:$0xff] }
   0x3   :  { %v101_v6 = vor.u32 %v104_v5, %v100_v2  ;;  %80 = vperm.xlu0 %106, %v77_v7   ;;  %v15_v10 = vld [vmem:[%s154_s1] sm:$0xf] }
   0x4   :  { %v29_v8 = vsel %vm27_vm0, %v94_v4, 0  ;;  %v46_v11 = vld [vmem:[%s154_s1] sm:$0xf] }
   0x5   :  { %38 = vmatpush.bf16.msra.mxu0 %v29_v8  ;;  %v59_v9 = vsel %vm27_vm0, %v101_v6, 0 }
   0x6   :  { %68 = vmatpush.bf16.msra.mxu1 %v59_v9 }
   0x8   :  { %95 = vmatmul.msk.bf16.vlgmr.msra.gmra.mxu0 %vm23_vm1, %v15_v10 }
   0x9   :  { %102 = vmatmul.msk.bf16.vlgmr.msra.gmra.mxu1 %vm23_vm1, %v46_v11 }
  0x75   :  { %v81_v14 = vpop.permute.xlu0 %80 }
  0x85   :  { %v40_v12 = vpop.f32.mrf.mxu0 }
  0x86   :  { %v70_v13 = vpop.f32.mrf.mxu1 }
  0x87   :  { %v74_v15 = vmax.f32 %v40_v12, %v70_v13 }
  0x89   :  { %v83_v16 = vadd.f32 %v81_v14, %v74_v15 }
  0x8b   :  { %v84_v17 = vmax.f32 %v83_v16, 0.0 }
  0x8d   :  { %v85_v18 = vpack.c.bf16 %v84_v17, %v84_v17  ;;  %v42_v19 = vpop.f32.mrf.mxu0 }
  0x8e   :  { %v72_v20 = vpop.f32.mrf.mxu1 }
  0x8f   :  { %86 = vst [vmem:[%s155_s3] sm:$0xf] %v85_v18 }

// kernel: _lambda_.5
= control target key start
LH: loop header
LB: loop body
LE: loop exit
PB: predicated region body
PF: predicated region fallthrough
CT: control target
= control target key end

     0   :  { %v102_v1 = vmov 0   ;;  %vm38_vm0 = vcmask 1043456   ;;  %vm34_vm1 = vcmask 195584   ;;  %s141_s0 = inlined_call_operand.vmem [shape: bf16[1,24,128], index: 0, kind: input, shape index: {}]   ;;  %s142_s2 = inlined_call_operand.vmem [shape: f32[16,1], index: 2, kind: input, shape index: {}]   ;;  %s143_s1 = inlined_call_operand.vmem [shape: bf16[16,24], index: 1, kind: input, shape index: {}]   ;;  %s144_s3 = inlined_call_operand.vmem [shape: bf16[16,128], index: 3, kind: output, shape index: {}]  }
   0x1   :  { %v19_v0 = vld [vmem:[%s141_s0 + $0x8] sm:$0xf]  ;;  %101 = vset.pattern.permute.xlu0 %v102_v1  ;;  %v60_v3 = vld [vmem:[%s142_s2] sm:$0xff] }
   0x2   :  { %v30_v2 = vunpack.c.l.b16 %v19_v0  ;;  %64 = vperm.xlu0 %101, %v60_v3   ;;  %v94_v6 = vld [vmem:[%s141_s0] sm:$0xff]  ;;  %v61_v7 = vld [vmem:[%s142_s2 + $0x8] sm:$0xff] }
   0x3   :  { %v93_v8 = vld [vmem:[%s143_s1] sm:$0xff] }
   0x4   :  { %v32_v4 = vpack.c.b16 %v30_v2, %v30_v2 }
   0x6   :  { %v40_v5 = vsel %vm38_vm0, %v32_v4, 0 }
   0x7   :  { %48 = vmatpush.bf16.msra.mxu0 %v40_v5 }
   0xa   :  { %69 = vperm.xlu0 %101, %v61_v7  }
   0xb   :  { %49 = vmatpush.bf16.msra.mxu0 %v94_v6 }
   0xe   :  { %92 = vmatmul.msk.bf16.vlgmr.msra.gmra.mxu0 %vm34_vm1, %v93_v8 }
  0x74   :  { %v65_v9 = vpop.permute.xlu0 %64 }
  0x7c   :  { %v70_v12 = vpop.permute.xlu0 %69 }
  0x8b   :  { %v51_v10 = vpop.f32.mrf.mxu0 }
  0x8c   :  { %v72_v11 = vadd.f32 %v65_v9, %v51_v10 }
  0x8e   :  { %v74_v15 = vmax.f32 %v72_v11, 0.0 }
  0x93   :  { %v53_v13 = vpop.f32.mrf.mxu0 }
  0x94   :  { %v73_v14 = vadd.f32 %v70_v12, %v53_v13 }
  0x96   :  { %v75_v16 = vmax.f32 %v73_v14, 0.0 }
  0x98   :  { %v98_v17 = vpack.c.bf16 %v75_v16, %v74_v15 }
  0x9a   :  { %99 = vst [vmem:[%s144_s3] sm:$0xff] %v98_v17  }

// kernel: _lambda_.6
= control target key start
LH: loop header
LB: loop body
LE: loop exit
PB: predicated region body
PF: predicated region fallthrough
CT: control target
= control target key end

     0   :  { %v202_v2 = vmov 0   ;;  %vm46_vm0 = vcmask 392192   ;;  %s256_s0 = inlined_call_operand.vmem [shape: bf16[2,48,128], index: 0, kind: input, shape index: {}]   ;;  %s257_s2 = inlined_call_operand.vmem [shape: f32[16,1], index: 2, kind: input, shape index: {}]   ;;  %s258_s1 = inlined_call_operand.vmem [shape: bf16[16,48], index: 1, kind: input, shape index: {}]   ;;  %s259_s3 = inlined_call_operand.vmem [shape: bf16[16,128], index: 3, kind: output, shape index: {}]  }
   0x1   :  { %v190_v0 = vld [vmem:[%s256_s0 + $0x10] sm:$0xff]  ;;  %v194_v1 = vld [vmem:[%s256_s0 + $0x28] sm:$0xff]  ;;  %201 = vset.pattern.permute.xlu0 %v202_v2  ;;  %v193_v4 = vld [vmem:[%s256_s0 + $0x20] sm:$0xff] }
   0x2   :  { %55 = vmatpush.bf16.msra.mxu0 %v190_v0  ;;  %108 = vmatpush.bf16.msra.mxu1 %v194_v1  ;;  %v189_v3 = vld [vmem:[%s256_s0 + $0x8] sm:$0xff]  ;;  %v123_v5 = vld [vmem:[%s257_s2] sm:$0xff]  ;;  %v192_v7 = vld [vmem:[%s256_s0 + $0x18] sm:$0xff] }
   0x3   :  { %127 = vperm.xlu0 %201, %v123_v5   ;;  %v188_v6 = vld [vmem:[%s256_s0] sm:$0xff]  ;;  %v124_v8 = vld [vmem:[%s257_s2 + $0x8] sm:$0xff] }
   0x4   :  { %v187_v9 = vld [vmem:[%s258_s1] sm:$0xff] }
   0x5   :  { %v191_v10 = vld [vmem:[%s258_s1] sm:$0xff] }
   0x6   :  { %56 = vmatpush.bf16.msra.mxu0 %v189_v3  ;;  %109 = vmatpush.bf16.msra.mxu1 %v193_v4 }
   0xa   :  { %57 = vmatpush.bf16.msra.mxu0 %v188_v6  ;;  %110 = vmatpush.bf16.msra.mxu1 %v192_v7 }
   0xb   :  { %132 = vperm.xlu0 %201, %v124_v8  }
   0xd   :  { %163 = vmatmul.msk.bf16.vlgmr.msra.gmra.mxu0 %vm46_vm0, %v187_v9  ;;  %186 = vmatmul.msk.bf16.vlgmr.msra.gmra.mxu1 %vm46_vm0, %v191_v10 }
  0x75   :  { %v128_v11 = vpop.permute.xlu0 %127 }
  0x7d   :  { %v133_v19 = vpop.permute.xlu0 %132 }
  0x8a   :  { %v59_v12 = vpop.f32.mrf.mxu0  ;;  %v112_v13 = vpop.f32.mrf.mxu1 }
  0x8b   :  { %v117_v14 = vmax.f32 %v59_v12, %v112_v13 }
  0x8d   :  { %v135_v17 = vadd.f32 %v128_v11, %v117_v14 }
  0x8f   :  { %v137_v21 = vmax.f32 %v135_v17, 0.0 }
  0x92   :  { %v61_v15 = vpop.f32.mrf.mxu0  ;;  %v114_v16 = vpop.f32.mrf.mxu1 }
  0x93   :  { %v118_v18 = vmax.f32 %v61_v15, %v114_v16 }
  0x95   :  { %v136_v20 = vadd.f32 %v133_v19, %v118_v18 }
  0x97   :  { %v138_v22 = vmax.f32 %v136_v20, 0.0 }
  0x99   :  { %v198_v23 = vpack.c.bf16 %v138_v22, %v137_v21 }
  0x9b   :  { %199 = vst [vmem:[%s259_s3] sm:$0xff] %v198_v23  }

// kernel: _lambda_.7
= control target key start
LH: loop header
LB: loop body
LE: loop exit
PB: predicated region body
PF: predicated region fallthrough
CT: control target
= control target key end

     0   :  { %vm30_vm0 = vcmask 1045504   ;;  %vm17_vm1 = vcmask 113664   ;;  %vm63_vm2 = vcmask 56320   ;;  %s128_s1 = inlined_call_operand.vmem [shape: f32[14,7], index: 1, kind: input, shape index: {}]   ;;  %s129_s0 = inlined_call_operand.vmem [shape: f32[32,14], index: 0, kind: input, shape index: {}]   ;;  %s130_s2 = inlined_call_operand.vmem [shape: f32[32,7], index: 2, kind: output, shape index: {}]  }
   0x1   :  { %v16_v0 = vld [vmem:[%s128_s1 + $0x8] sm:$0x3f]  ;;  %v15_v1 = vld [vmem:[%s128_s1] sm:$0xff]  ;;  %v13_v2 = vld [vmem:[%s129_s0 + $0x10] sm:$0xff] }
   0x2   :  { %78 = vmatpush.msk.msra.mxu2 %vm30_vm0, %v16_v0  ;;  %79 = vmatpush.msk.msra.mxu3 %vm30_vm0, %v16_v0  ;;  %v14_v3 = vld [vmem:[%s129_s0 + $0x18] sm:$0xff]  ;;  %v11_v4 = vld [vmem:[%s129_s0] sm:$0xff]  ;;  %v12_v5 = vld [vmem:[%s129_s0 + $0x8] sm:$0xff] }
   0x3   :  { %72 = vmatpush.msk.msra.mxu0 %vm30_vm0, %v16_v0  ;;  %77 = vmatpush.msk.msra.mxu1 %vm30_vm0, %v16_v0 }
   0x4   :  { %81 = vmatpush.msra.mxu2 %v15_v1  ;;  %82 = vmatpush.msra.mxu3 %v15_v1 }
   0x5   :  { %75 = vmatmul.msk.f32.vlgmr.msra.gmra.mxu2 %vm17_vm1, %v13_v2  ;;  %76 = vmatmul.msk.f32.vlgmr.msra.gmra.mxu3 %vm17_vm1, %v14_v3 }
   0x6   :  { %49 = vmatpush.msra.mxu0 %v15_v1  ;;  %80 = vmatpush.msra.mxu1 %v15_v1 }
   0x7   :  { %73 = vmatmul.msk.f32.vlgmr.msra.gmra.mxu0 %vm17_vm1, %v11_v4  ;;  %74 = vmatmul.msk.f32.vlgmr.msra.gmra.mxu1 %vm17_vm1, %v12_v5 }
  0x84   :  { %v51_v6 = vpop.f32.mrf.mxu0  ;;  %v54_v7 = vpop.f32.mrf.mxu1 }
  0x85   :  { %64 = vst.msk [vmem:[%s130_s2] sm:$0xff] %vm63_vm2, %v51_v6 }
  0x86   :  { %65 = vst.msk [vmem:[%s130_s2 + $0x8] sm:$0xff] %vm63_vm2, %v54_v7 }
  0x88   :  { %v57_v8 = vpop.f32.mrf.mxu2  ;;  %v60_v9 = vpop.f32.mrf.mxu3 }
  0x89   :  { %66 = vst.msk [vmem:[%s130_s2 + $0x10] sm:$0xff] %vm63_vm2, %v57_v8 }
  0x8a   :  { %67 = vst.msk [vmem:[%s130_s2 + $0x18] sm:$0xff] %vm63_vm2, %v60_v9 }

</bundles_post_ra>
